<compile_context>
chip_gen: v6e
topology: v6e:2x2x1
jax: 0.10.0
libtpu: 0.0.40
codegen_flags: <defaults>
</compile_context>

<pallas_src>
import math

import numpy as np
import jax
import jax.numpy as jnp
from jax.experimental import pallas as pl
from jax.experimental.pallas import tpu as pltpu


def _gaussian_kernel_np(kernel_size: int, sigma: float) -> np.ndarray:
    """Reproduces the PyTorch __init__ math in float32."""
    coords = np.arange(kernel_size, dtype=np.float32)
    x_grid = np.tile(coords, (kernel_size, 1))   # x_grid[i, j] = j
    y_grid = x_grid.T                            # y_grid[i, j] = i
    mean = (kernel_size - 1) / 2.0
    variance = float(sigma) ** 2.0
    g = (1.0 / (2.0 * math.pi * variance)) * np.exp(
        -((x_grid - mean) ** 2 + (y_grid - mean) ** 2) / (2.0 * variance))
    g = g / g.sum()
    return g.astype(np.float32)


def _make_lowpass_kernel(ks: int, pad: int, h: int, w: int,
                         h_out: int, w_out: int, weights: np.ndarray):
    hp, wp = h + 2 * pad, w + 2 * pad
    # Static Gaussian taps baked in as Python float constants.
    w_const = [[float(weights[i, j]) for j in range(ks)] for i in range(ks)]

    def kernel(x_ref, o_ref, pad_ref):
        # x_ref:   VMEM (B, H, W)         B fused (n, c) input planes
        # o_ref:   VMEM (B, Hout, Wout)   output planes
        # pad_ref: VMEM (B, Hp, Wp) f32   zero-padded scratch slab
        pad_ref[...] = jnp.zeros_like(pad_ref)
        pad_ref[:, pad:pad + h, pad:pad + w] = x_ref[...].astype(jnp.float32)

        acc = jnp.zeros(o_ref.shape, dtype=jnp.float32)
        for ki in range(ks):                        # unrolled at trace time
            row = pad_ref[:, ki:ki + h_out, :]      # (B, Hout, Wp) loaded once per ki
            for kj in range(ks):
                acc = acc + w_const[ki][kj] * row[:, :, kj:kj + w_out]
        o_ref[...] = acc.astype(o_ref.dtype)

    return kernel


def _choose_block_planes(nc: int, h: int, w: int, hp: int, wp: int,
                         h_out: int, w_out: int, itemsize: int) -> int:
    """How many (n, c) planes to process per grid step."""
    # Live bytes per plane: double-buffered input + output blocks + f32 scratch.
    per_plane = 2 * (h * w + h_out * w_out) * itemsize + hp * wp * 4
    budget = 4 * 1024 * 1024          # well under v7x's 64 MiB per-TC VMEM
    b = max(1, min(nc, budget // per_plane))
    while nc % b:                     # divisor of nc -> no partial blocks
        b -= 1
    if nc // b < 2 and nc > 1:        # keep >=2 grid steps for v7x's two TCs
        b = max(1, nc // 2)
        while nc % b:
            b -= 1
    return int(b)


def lowpass_forward(x: jnp.ndarray, kernel_size: int, padding: int,
                    sigma: float) -> jnp.ndarray:
    """Depthwise Gaussian conv2d, stride=1, groups=C, NCHW layout."""
    n, c, h, w = x.shape
    ks, pad = int(kernel_size), int(padding)
    h_out = h + 2 * pad - ks + 1
    w_out = w + 2 * pad - ks + 1
    assert h_out > 0 and w_out > 0
    hp, wp = h + 2 * pad, w + 2 * pad
    nc = n * c

    weights = _gaussian_kernel_np(ks, sigma)
    x2 = x.reshape(nc, h, w)                      # free reshape (contiguous)
    b = _choose_block_planes(nc, h, w, hp, wp, h_out, w_out, x.dtype.itemsize)

    kernel = _make_lowpass_kernel(ks, pad, h, w, h_out, w_out, weights)

    out = pl.pallas_call(
        kernel,
        out_shape=jax.ShapeDtypeStruct((nc, h_out, w_out), x.dtype),
        grid=(nc // b,),
        in_specs=[
            # Last two block dims equal the full array extents -> (8,128) rule ok;
            # each block is a contiguous chunk of HBM (full planes).
            pl.BlockSpec((b, h, w), lambda i: (i, 0, 0)),
        ],
        out_specs=pl.BlockSpec((b, h_out, w_out), lambda i: (i, 0, 0)),
        scratch_shapes=[pltpu.VMEM((b, hp, wp), jnp.float32)],
        compiler_params=pltpu.CompilerParams(
            dimension_semantics=("parallel",),
            vmem_limit_bytes=32 * 1024 * 1024,
        ),
    )(x2)
    return out.reshape(n, c, h_out, w_out)


def lowpass_reference(x: jnp.ndarray, kernel_size: int, padding: int,
                      sigma: float) -> jnp.ndarray:
    """Pure-JAX reference (lax depthwise conv) for correctness checking."""
    c = x.shape[1]
    gk = jnp.asarray(_gaussian_kernel_np(kernel_size, sigma))
    wgt = jnp.broadcast_to(gk, (c, 1, kernel_size, kernel_size)).astype(x.dtype)
    return jax.lax.conv_general_dilated(
        x, wgt, window_strides=(1, 1),
        padding=[(padding, padding), (padding, padding)],
        dimension_numbers=("NCHW", "OIHW", "NCHW"),
        feature_group_count=c,
    )


if __name__ == "__main__":
    kernel_size, padding, sigma = 3, 1, 1.0
    key = jax.random.PRNGKey(0)
    x = jax.random.normal(key, (2, 4, 16, 16), dtype=jnp.float32)

    y = lowpass_forward(x, kernel_size, padding, sigma)
    y = jax.block_until_ready(y)

    y_ref = lowpass_reference(x, kernel_size, padding, sigma)
    assert y.shape == y_ref.shape == (2, 4, 16, 16)
    assert jnp.allclose(y, y_ref, atol=1e-5, rtol=1e-5)

    print("KERNEL_OK")
</pallas_src>

<mosaic_0001>
module attributes {stable_mosaic.version = 11 : i64} {
  func.func @kernel(%arg0: i32, %arg1: memref<4x16x16xf32, #tpu.memory_space<vmem>>, %arg2: memref<4x16x16xf32, #tpu.memory_space<vmem>>, %arg3: memref<4x18x18xf32, #tpu.memory_space<vmem>>) attributes {dimension_semantics = [#tpu.dimension_semantics<parallel>], iteration_bounds = array<i64: 2>, scalar_prefetch = 0 : i64, scratch_operands = 1 : i64, tpu.core_type = #tpu.core_type<tc>, window_params = [{transform_indices = @transform_0, window_bounds = array<i64: 4, 16, 16>}, {transform_indices = @transform_1, window_bounds = array<i64: 4, 16, 16>}]} {
    %cst = arith.constant 0.000000e+00 : f32
    %0 = vector.broadcast %cst : f32 to vector<4x18x18xf32>
    %c0 = arith.constant 0 : index
    %c0_0 = arith.constant 0 : index
    %c0_1 = arith.constant 0 : index
    %1 = vector.load %arg3[%c0, %c0_0, %c0_1] : memref<4x18x18xf32, #tpu.memory_space<vmem>>, vector<4x18x18xf32>
    tpu.vector_store %arg3[%c0, %c0_0, %c0_1], %0 {strides = array<i32>} : memref<4x18x18xf32, #tpu.memory_space<vmem>>, vector<4x18x18xf32>,
    %c0_2 = arith.constant 0 : index
    %c0_3 = arith.constant 0 : index
    %c0_4 = arith.constant 0 : index
    %2 = vector.load %arg1[%c0_2, %c0_3, %c0_4] : memref<4x16x16xf32, #tpu.memory_space<vmem>>, vector<4x16x16xf32>
    %c0_5 = arith.constant 0 : index
    %c1 = arith.constant 1 : index
    %c1_6 = arith.constant 1 : index
    %3 = vector.load %arg3[%c0_5, %c1, %c1_6] : memref<4x18x18xf32, #tpu.memory_space<vmem>>, vector<4x16x16xf32>
    tpu.vector_store %arg3[%c0_5, %c1, %c1_6], %2 {strides = array<i32>} : memref<4x18x18xf32, #tpu.memory_space<vmem>>, vector<4x16x16xf32>,
    %cst_7 = arith.constant 0.000000e+00 : f32
    %4 = vector.broadcast %cst_7 : f32 to vector<4x16x16xf32>
    %c0_8 = arith.constant 0 : index
    %c0_9 = arith.constant 0 : index
    %c0_10 = arith.constant 0 : index
    %5 = vector.load %arg3[%c0_8, %c0_9, %c0_10] : memref<4x18x18xf32, #tpu.memory_space<vmem>>, vector<4x16x18xf32>
    %6 = vector.extract_strided_slice %5 {offsets = [0, 0, 0], sizes = [4, 16, 16], strides = [1, 1, 1]} : vector<4x16x18xf32> to vector<4x16x16xf32>
    %cst_11 = arith.constant 0.0751136094 : f32
    %7 = vector.broadcast %cst_11 : f32 to vector<4x16x16xf32>
    %8 = arith.mulf %7, %6 : vector<4x16x16xf32>
    %9 = arith.addf %4, %8 : vector<4x16x16xf32>
    %10 = vector.extract_strided_slice %5 {offsets = [0, 0, 1], sizes = [4, 16, 16], strides = [1, 1, 1]} : vector<4x16x18xf32> to vector<4x16x16xf32>
    %cst_12 = arith.constant 0.123841412 : f32
    %11 = vector.broadcast %cst_12 : f32 to vector<4x16x16xf32>
    %12 = arith.mulf %11, %10 : vector<4x16x16xf32>
    %13 = arith.addf %9, %12 : vector<4x16x16xf32>
    %14 = vector.extract_strided_slice %5 {offsets = [0, 0, 2], sizes = [4, 16, 16], strides = [1, 1, 1]} : vector<4x16x18xf32> to vector<4x16x16xf32>
    %cst_13 = arith.constant 0.0751136094 : f32
    %15 = vector.broadcast %cst_13 : f32 to vector<4x16x16xf32>
    %16 = arith.mulf %15, %14 : vector<4x16x16xf32>
    %17 = arith.addf %13, %16 : vector<4x16x16xf32>
    %c0_14 = arith.constant 0 : index
    %c1_15 = arith.constant 1 : index
    %c0_16 = arith.constant 0 : index
    %18 = vector.load %arg3[%c0_14, %c1_15, %c0_16] : memref<4x18x18xf32, #tpu.memory_space<vmem>>, vector<4x16x18xf32>
    %19 = vector.extract_strided_slice %18 {offsets = [0, 0, 0], sizes = [4, 16, 16], strides = [1, 1, 1]} : vector<4x16x18xf32> to vector<4x16x16xf32>
    %cst_17 = arith.constant 0.123841412 : f32
    %20 = vector.broadcast %cst_17 : f32 to vector<4x16x16xf32>
    %21 = arith.mulf %20, %19 : vector<4x16x16xf32>
    %22 = arith.addf %17, %21 : vector<4x16x16xf32>
    %23 = vector.extract_strided_slice %18 {offsets = [0, 0, 1], sizes = [4, 16, 16], strides = [1, 1, 1]} : vector<4x16x18xf32> to vector<4x16x16xf32>
    %cst_18 = arith.constant 0.204179958 : f32
    %24 = vector.broadcast %cst_18 : f32 to vector<4x16x16xf32>
    %25 = arith.mulf %24, %23 : vector<4x16x16xf32>
    %26 = arith.addf %22, %25 : vector<4x16x16xf32>
    %27 = vector.extract_strided_slice %18 {offsets = [0, 0, 2], sizes = [4, 16, 16], strides = [1, 1, 1]} : vector<4x16x18xf32> to vector<4x16x16xf32>
    %cst_19 = arith.constant 0.123841412 : f32
    %28 = vector.broadcast %cst_19 : f32 to vector<4x16x16xf32>
    %29 = arith.mulf %28, %27 : vector<4x16x16xf32>
    %30 = arith.addf %26, %29 : vector<4x16x16xf32>
    %c0_20 = arith.constant 0 : index
    %c2 = arith.constant 2 : index
    %c0_21 = arith.constant 0 : index
    %31 = vector.load %arg3[%c0_20, %c2, %c0_21] : memref<4x18x18xf32, #tpu.memory_space<vmem>>, vector<4x16x18xf32>
    %32 = vector.extract_strided_slice %31 {offsets = [0, 0, 0], sizes = [4, 16, 16], strides = [1, 1, 1]} : vector<4x16x18xf32> to vector<4x16x16xf32>
    %cst_22 = arith.constant 0.0751136094 : f32
    %33 = vector.broadcast %cst_22 : f32 to vector<4x16x16xf32>
    %34 = arith.mulf %33, %32 : vector<4x16x16xf32>
    %35 = arith.addf %30, %34 : vector<4x16x16xf32>
    %36 = vector.extract_strided_slice %31 {offsets = [0, 0, 1], sizes = [4, 16, 16], strides = [1, 1, 1]} : vector<4x16x18xf32> to vector<4x16x16xf32>
    %cst_23 = arith.constant 0.123841412 : f32
    %37 = vector.broadcast %cst_23 : f32 to vector<4x16x16xf32>
    %38 = arith.mulf %37, %36 : vector<4x16x16xf32>
    %39 = arith.addf %35, %38 : vector<4x16x16xf32>
    %40 = vector.extract_strided_slice %31 {offsets = [0, 0, 2], sizes = [4, 16, 16], strides = [1, 1, 1]} : vector<4x16x18xf32> to vector<4x16x16xf32>
    %cst_24 = arith.constant 0.0751136094 : f32
    %41 = vector.broadcast %cst_24 : f32 to vector<4x16x16xf32>
    %42 = arith.mulf %41, %40 : vector<4x16x16xf32>
    %43 = arith.addf %39, %42 : vector<4x16x16xf32>
    %c0_25 = arith.constant 0 : index
    %c0_26 = arith.constant 0 : index
    %c0_27 = arith.constant 0 : index
    %44 = vector.load %arg2[%c0_25, %c0_26, %c0_27] : memref<4x16x16xf32, #tpu.memory_space<vmem>>, vector<4x16x16xf32>
    tpu.vector_store %arg2[%c0_25, %c0_26, %c0_27], %43 {strides = array<i32>} : memref<4x16x16xf32, #tpu.memory_space<vmem>>, vector<4x16x16xf32>,
    return
  }
  func.func @transform_0(%arg0: i32) -> (i32, i32, i32) {
    %c0_i32 = arith.constant 0 : i32
    %c0_i32_0 = arith.constant 0 : i32
    %c0_i32_1 = arith.constant 0 : i32
    return %arg0, %c0_i32, %c0_i32_0 : i32, i32, i32
  }
  func.func @transform_1(%arg0: i32) -> (i32, i32, i32) {
    %c0_i32 = arith.constant 0 : i32
    %c0_i32_0 = arith.constant 0 : i32
    %c0_i32_1 = arith.constant 0 : i32
    return %arg0, %c0_i32, %c0_i32_0 : i32, i32, i32
  }
}

</mosaic_0001>

<bundles_post_ra>
// kernel: tpu_custom_call.1
= control target key start
LH: loop header
LB: loop body
LE: loop exit
PB: predicated region body
PF: predicated region fallthrough
CT: control target
= control target key end

     0   :  { %6 = vsyncpa [#allocation4], 0  ;;  %s1167_s0 = inlined_call_operand.hbm [shape: f32[8,16,16], index: 0, kind: input, shape index: {}]   ;;  %s1168_s1 = inlined_call_operand.hbm [shape: f32[8,16,16], index: 1, kind: output, shape index: {}]  }
   0x1   :  { %8 = vsyncpa [#allocation4 + $0x1], 0 }
   0x2   :  { %9 = vsyncpa [#allocation5], 0 }
   0x3   :  { %11 = vsyncpa [#allocation5 + $0x1], 0  ;;  %s822_s6 = smov 0   ;;  %s824_s7 = smov 0  }
   0x4   :  { %s826_s8 = smov 0   ;;  %s828_s9 = smov 0  }
   0x5 LB: > { %s843_s10 = sadd.s32 4294967295, %s800_s9   ;;  %s634_s11 = sadd.s32 4294967294, %s800_s9   ;;  %s800_s9 = sphi %s828_s9, %s1202_s9   ;;  %s796_s8 = sphi %s826_s8, %s1201_s8   ;;  %s792_s7 = sphi %s824_s7, %s1200_s7   ;;  %s788_s6 = sphi %s822_s6, %s1199_s6  }
   0x6   : > { %s847_s12 = sadd.s32 1, %s800_s9   ;;  %s24_s13 = sadd.s32 1, %s796_s8 }
   0x7   : > { %s21_s14 = ssub.s32 %s800_s9, %s847_s12  ;;  %p31_p0 = scmp.ne.s32.totalorder %s796_s8, %s792_s7 }
   0x8   : > { %p22_p1 = scmp.eq.s32.totalorder %s21_s14, 0  ;;  %p32_p2 = scmp.eq.s32.totalorder %s800_s9, 0 }
   0x9   : > { %p37_p3 = scmp.ne.s32.totalorder %s792_s7, %s788_s6  ;;  %p38_p4 = scmp.eq.s32.totalorder %s843_s10, 0 }
   0xa   : > { %s859_s15 = scalar_select %p22_p1, %s796_s8, %s24_s13  }
   0xb   : > { %p861_p5 = por %p32_p2, %p31_p0  ;;  %p865_p6 = por %p38_p4, %p37_p3 }
   0xc   : > { %p61_p7 = scmp.eq.s32.totalorder %s843_s10, 1  ;;  %p67_p8 = scmp.eq.s32.totalorder %s634_s11, 1 }
   0xd   : > { %s1177_s17 = scalar_select %p865_p6, 1, 0 }
   0xe   : > { %p666_p10 = scmp.lt.s32.totalorder %s800_s9, 2  ;;  %p872_p11 = por %p61_p7, %p31_p0 }
   0xf   : > { %p876_p12 = por %p67_p8, %p37_p3  ;;  %s87_s20 = sand.u32 1, %s796_s8  }
  0x10   : > { %s1178_s18 = scalar_select %p872_p11, 1, 0 }
  0x11   : > { %s1179_s19 = scalar_select %p876_p12, 1, 0 }
  0x12   : > { %s651_s21 = sshll.u32 %s800_s9, 10  ;;  %s637_s22 = sshll.u32 %s87_s20, 6 }
  0x13   : > { %s885_s25 = scalar_lea.hbm %s1167_s0, %s651_s21  ;;  %s91_s26 = scalar_lea.vmem [#allocation3], %s637_s22 }
  0x14   : > { %s99_s27 = sshll.u32 %s91_s26, 4  ;;  %p889_p13 = pnand %p666_p10, %p861_p5  ;;  %s893_s27 = int_to_ptr.vmem [resolvable:$true] %s99_s27 }
  0x15   : > { %s895_s29 = scalar_lea.sflag [#allocation4], %s87_s20  ;;  %s708_s30 = scalar_lea.hbm %s885_s25, 1024 }
  0x16   : > { %p709_p0 = scmp.ne.s32.totalorder %s885_s25, %s708_s30  ;;  %p710_p1 = pneg %p889_p13 }
  0x17   : > { %s713_s4 = scalar_lea.hbm %s1167_s0, 2048  ;;  %p714_p4 = scmp.lt.s32.totalorder %s885_s25, %s1167_s0 }
  0x18   : > { %p711_p2 = pnand %p710_p1, %p709_p0  ;;  %p715_p5 = scmp.lt.s32.totalorder %s713_s4, %s708_s30 }
  0x1a   : > { %p712_p3 = pneg %p711_p2  ;;  %p716_p7 = por %p715_p5, %p714_p4 }
  0x1c   : > { %p717_p8 = pnand %p716_p7, %p712_p3 }
  0x1e   : > { %720 = shalt.err (!%p717_p8)
}
  0x1f   : > { %s721_s13 = scalar_lea.vmem %s893_s27, 1024  ;;  %s802_s14 = smov [#allocation3]  }
  0x20   : > { %p722_p10 = scmp.ne.s32.totalorder %s893_s27, %s721_s13  ;;  %s726_s16 = sshll.u32 %s802_s14, 4  ;;  %s727_s16 = int_to_ptr.vmem [resolvable:$false] %s726_s16 }
  0x21   : > { %s728_s20 = scalar_lea.vmem %s727_s16, 2048  ;;  %p729_p2 = scmp.lt.s32.totalorder %s893_s27, %s727_s16 }
  0x22   : > { %p724_p9 = pnand %p722_p10, %p710_p1  ;;  %p730_p12 = scmp.lt.s32.totalorder %s728_s20, %s721_s13 }
  0x24   : > { %p725_p0 = pneg %p724_p9  ;;  %p731_p11 = por %p730_p12, %p729_p2 }
  0x26   : > { %p732_p6 = pnand %p731_p11, %p725_p0 }
  0x28   : > { %735 = shalt.err (!%p732_p6)
}
  0x29   : > { %s803_s21 = smov 128   ;;  %s804_s22 = smov 8  }
  0x2a   : > { %661 = dma.hbm_to_vmem [thread:$0]  (!%p889_p13), %s885_s25, 1024, %s893_s27, %s895_s29, %s803_s21, %s803_s21, %s804_s22  }
  0x2b   : > { %p641_p9 = scmp.ge.s32.totalorder %s800_s9, 1  ;;  %p107_p1 = scmp.lt.s32.totalorder %s800_s9, 3 }
  0x2d   : > { %p108_p3 = pnand %p641_p9, %p107_p1 }
  0x2f   : > { %111 = sbr.rel (%p108_p3) target bundleno = 410 (0x19a), region = 24 }
  0x34   : > { %s919_s23 = sand.u32 1, %s792_s7   ;;  %p1181_p6 = scmp.ne.s32.totalorder %s1177_s17, 0 }
  0x35   : > { %s642_s24 = sshll.u32 %s919_s23, 6  ;;  %s114_s26 = scalar_lea.sflag [#allocation4], %s919_s23 }
  0x36   : > { %s925_s30 = scalar_lea.vmem [#allocation3], %s642_s24 }
  0x37   : > { %779 = dma.done.wait (%p1181_p6), %s114_s26, 1024  }
  0x38   : > { %781 = vsyncadd (%p1181_p6), %s114_s26, 4294966272  ;;  %vm138_vm0 = vcmask 146432   ;;  %vm141_vm1 = vcmask 140288   ;;  %v805_v0 = vmov 0.0   ;;  %v154_v1 = vld [vmem:[%s925_s30 + $0x10] sm:$0xff]  ;;  %v152_v2 = vld [vmem:[%s925_s30] sm:$0xff] }
  0x39   : > { %143 = vst.msk [vmem:[#allocation2 + $0x18] sm:$0xff] %vm138_vm0, %v805_v0  ;;  %144 = vst.msk [vmem:[#allocation2 + $0x20] sm:$0xff] %vm138_vm0, %v805_v0  ;;  %s806_s17 = smov 1   ;;  %v155_v3 = vld [vmem:[%s925_s30 + $0x18] sm:$0xff]  ;;  %v153_v4 = vld [vmem:[%s925_s30 + $0x8] sm:$0xff]  ;;  %vm192_vm2 = vcmask 138248  }
  0x3a   : > { %139 = vst.msk [vmem:[#allocation2] sm:$0xff] %vm138_vm0, %v805_v0  ;;  %140 = vst.msk [vmem:[#allocation2 + $0x8] sm:$0xff] %vm138_vm0, %v805_v0  ;;  %172 = vrot.lane.b32.xlu1 %v154_v1, %s806_s17  ;;  %168 = vrot.lane.b32.xlu0 %v152_v2, %s806_s17  ;;  %v156_v5 = vld [vmem:[%s925_s30 + $0x20] sm:$0xff]  ;;  %v157_v6 = vld [vmem:[%s925_s30 + $0x28] sm:$0xff]  ;;  %s807_s25 = smov 127   ;;  %s808_s27 = smov 126  }
  0x3b   : > { %146 = vst.msk [vmem:[#allocation2 + $0x30] sm:$0xff] %vm138_vm0, %v805_v0  ;;  %147 = vst.msk [vmem:[#allocation2 + $0x38] sm:$0xff] %vm138_vm0, %v805_v0  ;;  %v158_v7 = vld [vmem:[%s925_s30 + $0x30] sm:$0xff]  ;;  %v159_v8 = vld [vmem:[%s925_s30 + $0x38] sm:$0xff]  ;;  %vm537_vm3 = vcmask 130048   ;;  %s1091_s28 = scalar_lea.vmem [#allocation6], %s642_s24 }
  0x3c   : > { %149 = vst.msk [vmem:[#allocation2 + $0x48] sm:$0xff] %vm138_vm0, %v805_v0  ;;  %150 = vst.msk [vmem:[#allocation2 + $0x50] sm:$0xff] %vm138_vm0, %v805_v0  ;;  %s653_s29 = sshll.u32 %s843_s10, 10  ;;  %s561_s2 = sshll.u32 %s1091_s28, 4  ;;  %s1122_s2 = int_to_ptr.vmem [resolvable:$true] %s561_s2 }
  0x3d   : > { %145 = vst.msk [vmem:[#allocation2 + $0x28] sm:$0x3] %vm141_vm1, %v805_v0  ;;  %142 = vst.msk [vmem:[#allocation2 + $0x10] sm:$0x3] %vm141_vm1, %v805_v0  ;;  %s1120_s5 = scalar_lea.hbm %s1168_s1, %s653_s29  ;;  %s547_s10 = scalar_lea.sflag [#allocation5], %s919_s23 }
  0x3e   : > { %148 = vst.msk [vmem:[#allocation2 + $0x40] sm:$0x3] %vm141_vm1, %v805_v0  ;;  %151 = vst.msk [vmem:[#allocation2 + $0x58] sm:$0x3] %vm141_vm1, %v805_v0  ;;  %174 = vrot.lane.b32.xlu1 %v155_v3, %s806_s17  ;;  %170 = vrot.lane.b32.xlu0 %v153_v4, %s806_s17  ;;  %s736_s11 = scalar_lea.vmem %s1122_s2, 1024  ;;  %p1196_p12 = scmp.ne.s32.totalorder %s1178_s18, 0 }
  0x3f   : > { %p737_p11 = scmp.ne.s32.totalorder %s1122_s2, %s736_s11  ;;  %s809_s13 = smov [#allocation6]  }
  0x40   : > { %s740_s14 = sshll.u32 %s809_s13, 4  ;;  %s741_s14 = int_to_ptr.vmem [resolvable:$false] %s740_s14 }
  0x41   : > { %p738_p13 = pnand %p737_p11, %p1196_p12  ;;  %s742_s16 = scalar_lea.vmem %s741_s14, 2048 }
  0x42   : > { %176 = vrot.lane.b32.xlu0 %v156_v5, %s806_s17  ;;  %178 = vrot.lane.b32.xlu1 %v157_v6, %s806_s17  ;;  %p743_p5 = scmp.lt.s32.totalorder %s1122_s2, %s741_s14  ;;  %p744_p7 = scmp.lt.s32.totalorder %s742_s16, %s736_s11 }
  0x43   : > { %p739_p4 = pneg %p738_p13 }
  0x44   : > { %p745_p8 = por %p744_p7, %p743_p5 }
  0x46   : > { %180 = vrot.lane.b32.xlu0 %v158_v7, %s806_s17  ;;  %182 = vrot.lane.b32.xlu1 %v159_v8, %s806_s17  ;;  %p746_p10 = pnand %p745_p8, %p739_p4 }
  0xac   : > { %v173_v9 = vpop.permute.xlu1 %172  ;;  %v169_v10 = vpop.permute.xlu0 %168 }
  0xad   : > { %195 = vst.msk [vmem:[#allocation2 + $0x19] sm:$0xff] %vm192_vm2, %v173_v9  ;;  %193 = vst.msk [vmem:[#allocation2 + $0x1] sm:$0xff] %vm192_vm2, %v169_v10 }
  0xb0   : > { %v175_v11 = vpop.permute.xlu1 %174  ;;  %v171_v12 = vpop.permute.xlu0 %170 }
  0xb1   : > { %196 = vst.msk [vmem:[#allocation2 + $0x21] sm:$0xff] %vm192_vm2, %v175_v11  ;;  %194 = vst.msk [vmem:[#allocation2 + $0x9] sm:$0xff] %vm192_vm2, %v171_v12 }
  0xb4   : > { %v177_v13 = vpop.permute.xlu0 %176  ;;  %v201_v14 = vld [vmem:[#allocation2] sm:$0xff]  ;;  %v179_v15 = vpop.permute.xlu1 %178  ;;  %v203_v16 = vld [vmem:[#allocation2 + $0x18] sm:$0xff] }
  0xb5   : > { %197 = vst.msk [vmem:[#allocation2 + $0x31] sm:$0xff] %vm192_vm2, %v177_v13  ;;  %v225_v17 = vmul.f32 0.12384141, %v201_v14  ;;  %198 = vst.msk [vmem:[#allocation2 + $0x39] sm:$0xff] %vm192_vm2, %v179_v15  ;;  %v227_v18 = vmul.f32 0.12384141, %v203_v16 }
  0xb6   : > { %v954_v33 = vmul.f32 0.07511361, %v201_v14  ;;  %v961_v35 = vmul.f32 0.07511361, %v203_v16  ;;  %v313_v40 = vld [vmem:[#allocation2 + $0x1] sm:$0xff]  ;;  %v315_v44 = vld [vmem:[#allocation2 + $0x19] sm:$0xff] }
  0xb7   : > { %241 = vrot.lane.b32.xlu0 %v225_v17, %s807_s25  ;;  %v337_v42 = vmul.f32 0.20417996, %v313_v40  ;;  %v339_v46 = vmul.f32 0.20417996, %v315_v44  ;;  %v994_v57 = vmul.f32 0.12384141, %v313_v40 }
  0xb8   : > { %v181_v19 = vpop.permute.xlu0 %180  ;;  %v202_v20 = vld [vmem:[#allocation2 + $0x8] sm:$0xff]  ;;  %v183_v21 = vpop.permute.xlu1 %182  ;;  %v204_v23 = vld [vmem:[#allocation2 + $0x20] sm:$0xff]  ;;  %v1001_v59 = vmul.f32 0.12384141, %v315_v44 }
  0xb9   : > { %199 = vst.msk [vmem:[#allocation2 + $0x49] sm:$0xff] %vm192_vm2, %v181_v19  ;;  %v226_v22 = vmul.f32 0.12384141, %v202_v20  ;;  %200 = vst.msk [vmem:[#allocation2 + $0x51] sm:$0xff] %vm192_vm2, %v183_v21  ;;  %v228_v26 = vmul.f32 0.12384141, %v204_v23 }
  0xba   : > { %v959_v34 = vmul.f32 0.07511361, %v202_v20  ;;  %v967_v36 = vmul.f32 0.07511361, %v204_v23  ;;  %v314_v43 = vld [vmem:[#allocation2 + $0x9] sm:$0xff]  ;;  %v316_v47 = vld [vmem:[#allocation2 + $0x21] sm:$0xff] }
  0xbb   : > { %243 = vrot.lane.b32.xlu1 %v226_v22, %s807_s25  ;;  %245 = vrot.lane.b32.xlu0 %v227_v18, %s807_s25  ;;  %v338_v45 = vmul.f32 0.20417996, %v314_v43  ;;  %v340_v49 = vmul.f32 0.20417996, %v316_v47  ;;  %v999_v58 = vmul.f32 0.12384141, %v314_v43 }
  0xbc   : > { %v205_v24 = vld [vmem:[#allocation2 + $0x30] sm:$0xff]  ;;  %v206_v25 = vld [vmem:[#allocation2 + $0x38] sm:$0xff]  ;;  %v1007_v60 = vmul.f32 0.12384141, %v316_v47  ;;  %v425_v0 = vld [vmem:[#allocation2 + $0x2] sm:$0xff] }
  0xbd   : > { %v229_v27 = vmul.f32 0.12384141, %v205_v24  ;;  %v230_v28 = vmul.f32 0.12384141, %v206_v25  ;;  %v969_v37 = vmul.f32 0.07511361, %v205_v24 }
  0xbe   : > { %v975_v38 = vmul.f32 0.07511361, %v206_v25  ;;  %v317_v48 = vld [vmem:[#allocation2 + $0x31] sm:$0xff]  ;;  %v318_v51 = vld [vmem:[#allocation2 + $0x39] sm:$0xff]  ;;  %v449_v2 = vmul.f32 0.12384141, %v425_v0 }
  0xbf   : > { %247 = vrot.lane.b32.xlu1 %v228_v26, %s807_s25  ;;  %249 = vrot.lane.b32.xlu0 %v229_v27, %s807_s25  ;;  %v341_v50 = vmul.f32 0.20417996, %v317_v48  ;;  %v342_v53 = vmul.f32 0.20417996, %v318_v51  ;;  %v1009_v61 = vmul.f32 0.12384141, %v317_v48 }
  0xc0   : > { %v207_v29 = vld [vmem:[#allocation2 + $0x48] sm:$0xff]  ;;  %v208_v30 = vld [vmem:[#allocation2 + $0x50] sm:$0xff]  ;;  %v1015_v62 = vmul.f32 0.12384141, %v318_v51  ;;  %v427_v4 = vld [vmem:[#allocation2 + $0x1a] sm:$0xff] }
  0xc1   : > { %v231_v31 = vmul.f32 0.12384141, %v207_v29  ;;  %v232_v32 = vmul.f32 0.12384141, %v208_v30  ;;  %v977_v39 = vmul.f32 0.07511361, %v207_v29 }
  0xc2   : > { %v983_v41 = vmul.f32 0.07511361, %v208_v30  ;;  %v319_v52 = vld [vmem:[#allocation2 + $0x49] sm:$0xff]  ;;  %v320_v55 = vld [vmem:[#allocation2 + $0x51] sm:$0xff]  ;;  %v451_v6 = vmul.f32 0.12384141, %v427_v4 }
  0xc3   : > { %251 = vrot.lane.b32.xlu1 %v230_v28, %s807_s25  ;;  %253 = vrot.lane.b32.xlu0 %v231_v31, %s807_s25  ;;  %v343_v54 = vmul.f32 0.20417996, %v319_v52  ;;  %v344_v56 = vmul.f32 0.20417996, %v320_v55  ;;  %v1017_v63 = vmul.f32 0.12384141, %v319_v52 }
  0xc4   : > { %v1023_v1 = vmul.f32 0.12384141, %v320_v55  ;;  %v426_v3 = vld [vmem:[#allocation2 + $0xa] sm:$0xff]  ;;  %v428_v7 = vld [vmem:[#allocation2 + $0x22] sm:$0xff]  ;;  %v429_v8 = vld [vmem:[#allocation2 + $0x32] sm:$0xff] }
  0xc5   : > { %v450_v5 = vmul.f32 0.12384141, %v426_v3  ;;  %v452_v9 = vmul.f32 0.12384141, %v428_v7  ;;  %v453_v10 = vmul.f32 0.12384141, %v429_v8 }
  0xc6   : > { %v430_v11 = vld [vmem:[#allocation2 + $0x3a] sm:$0xff]  ;;  %v431_v12 = vld [vmem:[#allocation2 + $0x4a] sm:$0xff]  ;;  %v432_v15 = vld [vmem:[#allocation2 + $0x52] sm:$0xff]  ;;  %v1034_v17 = vmul.f32 0.07511361, %v425_v0 }
  0xc7   : > { %255 = vrot.lane.b32.xlu1 %v232_v32, %s807_s25  ;;  %281 = vrot.lane.b32.xlu0 %v954_v33, %s808_s27  ;;  %v454_v13 = vmul.f32 0.12384141, %v430_v11  ;;  %v455_v14 = vmul.f32 0.12384141, %v431_v12  ;;  %v456_v16 = vmul.f32 0.12384141, %v432_v15 }
  0xc8   : > { %v1039_v18 = vmul.f32 0.07511361, %v426_v3  ;;  %v1041_v19 = vmul.f32 0.07511361, %v427_v4  ;;  %v1047_v20 = vmul.f32 0.07511361, %v428_v7 }
  0xc9   : > { %v1049_v21 = vmul.f32 0.07511361, %v429_v8  ;;  %v1055_v22 = vmul.f32 0.07511361, %v430_v11  ;;  %v1057_v23 = vmul.f32 0.07511361, %v431_v12 }
  0xca   : > { %1182 = vst [vmem:[#allocation9_spill] sm:$0xff] %v1047_v20  ;;  %v1063_v24 = vmul.f32 0.07511361, %v432_v15 }
  0xcb   : > { %283 = vrot.lane.b32.xlu1 %v959_v34, %s808_s27  ;;  %285 = vrot.lane.b32.xlu0 %v961_v35, %s808_s27  ;;  %1183 = vst [vmem:[#allocation10_spill] sm:$0xff] %v1049_v21  ;;  %1184 = vst [vmem:[#allocation11_spill] sm:$0xff] %v1055_v22 }
  0xcc   : > { %1185 = vst [vmem:[#allocation12_spill] sm:$0xff] %v1057_v23  ;;  %1186 = vst [vmem:[#allocation13_spill] sm:$0xff] %v1063_v24 }
  0xcf   : > { %287 = vrot.lane.b32.xlu1 %v967_v36, %s808_s27  ;;  %289 = vrot.lane.b32.xlu0 %v969_v37, %s808_s27 }
  0xd3   : > { %291 = vrot.lane.b32.xlu1 %v975_v38, %s808_s27  ;;  %293 = vrot.lane.b32.xlu0 %v977_v39, %s808_s27 }
  0xd7   : > { %295 = vrot.lane.b32.xlu1 %v983_v41, %s808_s27  ;;  %353 = vrot.lane.b32.xlu0 %v337_v42, %s807_s25 }
  0xdb   : > { %355 = vrot.lane.b32.xlu1 %v338_v45, %s807_s25  ;;  %357 = vrot.lane.b32.xlu0 %v339_v46, %s807_s25 }
  0xdf   : > { %359 = vrot.lane.b32.xlu1 %v340_v49, %s807_s25  ;;  %361 = vrot.lane.b32.xlu0 %v341_v50, %s807_s25 }
  0xe3   : > { %363 = vrot.lane.b32.xlu1 %v342_v53, %s807_s25  ;;  %365 = vrot.lane.b32.xlu0 %v343_v54, %s807_s25 }
  0xe7   : > { %367 = vrot.lane.b32.xlu1 %v344_v56, %s807_s25  ;;  %393 = vrot.lane.b32.xlu0 %v994_v57, %s808_s27 }
  0xeb   : > { %395 = vrot.lane.b32.xlu1 %v999_v58, %s808_s27  ;;  %397 = vrot.lane.b32.xlu0 %v1001_v59, %s808_s27 }
  0xef   : > { %399 = vrot.lane.b32.xlu1 %v1007_v60, %s808_s27  ;;  %401 = vrot.lane.b32.xlu0 %v1009_v61, %s808_s27 }
  0xf3   : > { %403 = vrot.lane.b32.xlu1 %v1015_v62, %s808_s27  ;;  %405 = vrot.lane.b32.xlu0 %v1017_v63, %s808_s27 }
  0xf7   : > { %407 = vrot.lane.b32.xlu1 %v1023_v1, %s808_s27  ;;  %465 = vrot.lane.b32.xlu0 %v449_v2, %s807_s25 }
  0xfb   : > { %467 = vrot.lane.b32.xlu1 %v450_v5, %s807_s25  ;;  %469 = vrot.lane.b32.xlu0 %v451_v6, %s807_s25 }
  0xff   : > { %471 = vrot.lane.b32.xlu1 %v452_v9, %s807_s25  ;;  %473 = vrot.lane.b32.xlu0 %v453_v10, %s807_s25 }
 0x103   : > { %475 = vrot.lane.b32.xlu1 %v454_v13, %s807_s25  ;;  %477 = vrot.lane.b32.xlu0 %v455_v14, %s807_s25 }
 0x107   : > { %479 = vrot.lane.b32.xlu1 %v456_v16, %s807_s25  ;;  %505 = vrot.lane.b32.xlu0 %v1034_v17, %s808_s27 }
 0x10b   : > { %507 = vrot.lane.b32.xlu1 %v1039_v18, %s808_s27  ;;  %509 = vrot.lane.b32.xlu0 %v1041_v19, %s808_s27 }
 0x10f   : > { %511 = vrot.lane.b32.xlu1 %v1047_v20, %s808_s27  ;;  %513 = vrot.lane.b32.xlu0 %v1049_v21, %s808_s27 }
 0x113   : > { %515 = vrot.lane.b32.xlu1 %v1055_v22, %s808_s27  ;;  %517 = vrot.lane.b32.xlu0 %v1057_v23, %s808_s27 }
 0x117   : > { %519 = vrot.lane.b32.xlu1 %v1063_v24, %s808_s27 }
 0x129   : > { %v242_v25 = vpop.permute.xlu0 %241 }
 0x12a   : > { %v265_v8 = vadd.f32 %v242_v25, %v954_v33 }
 0x12d   : > { %v244_v26 = vpop.permute.xlu1 %243  ;;  %v246_v27 = vpop.permute.xlu0 %245 }
 0x12e   : > { %v266_v12 = vadd.f32 %v244_v26, %v959_v34  ;;  %v267_v13 = vadd.f32 %v246_v27, %v961_v35 }
 0x131   : > { %v248_v28 = vpop.permute.xlu1 %247  ;;  %v250_v29 = vpop.permute.xlu0 %249 }
 0x132   : > { %v268_v22 = vadd.f32 %v248_v28, %v967_v36 }
 0x135   : > { %v252_v30 = vpop.permute.xlu1 %251  ;;  %v254_v31 = vpop.permute.xlu0 %253 }
 0x136   : > { %v270_v26 = vadd.f32 %v252_v30, %v975_v38  ;;  %v271_v27 = vadd.f32 %v254_v31, %v977_v39 }
 0x139   : > { %v256_v32 = vpop.permute.xlu1 %255  ;;  %v282_v40 = vpop.permute.xlu0 %281 }
 0x13a   : > { %v305_v11 = vadd.f32 %v282_v40, %v265_v8 }
 0x13c   : > { %v329_v23 = vadd.f32 %v994_v57, %v305_v11  ;;  %v1194_v11 = vld [vmem:[#allocation12_spill] sm:$0xff] }
 0x13d   : > { %v284_v42 = vpop.permute.xlu1 %283  ;;  %v286_v43 = vpop.permute.xlu0 %285 }
 0x13e   : > { %v306_v16 = vadd.f32 %v284_v42, %v266_v12  ;;  %v307_v24 = vadd.f32 %v286_v43, %v267_v13 }
 0x140   : > { %v330_v40 = vadd.f32 %v999_v58, %v306_v16  ;;  %v331_v34 = vadd.f32 %v1001_v59, %v307_v24  ;;  %v272_v59 = vadd.f32 %v256_v32, %v983_v41 }
 0x141   : > { %v288_v44 = vpop.permute.xlu1 %287  ;;  %v290_v45 = vpop.permute.xlu0 %289 }
 0x142   : > { %v308_v33 = vadd.f32 %v288_v44, %v268_v22 }
 0x145   : > { %v292_v46 = vpop.permute.xlu1 %291  ;;  %v294_v47 = vpop.permute.xlu0 %293 }
 0x146   : > { %v310_v43 = vadd.f32 %v292_v46, %v270_v26  ;;  %v311_v36 = vadd.f32 %v294_v47, %v271_v27 }
 0x148   : > { %v334_v30 = vadd.f32 %v1015_v62, %v310_v43 }
 0x149   : > { %v296_v48 = vpop.permute.xlu1 %295  ;;  %v354_v49 = vpop.permute.xlu0 %353 }
 0x14a   : > { %v377_v21 = vadd.f32 %v354_v49, %v329_v23  ;;  %v312_v39 = vadd.f32 %v296_v48, %v272_v59  ;;  %v1189_v48 = vld [vmem:[#allocation9_spill] sm:$0xff] }
 0x14c   : > { %v336_v62 = vadd.f32 %v1023_v1, %v312_v39  ;;  %v1192_v1 = vld [vmem:[#allocation11_spill] sm:$0xff] }
 0x14d   : > { %v356_v50 = vpop.permute.xlu1 %355  ;;  %v358_v51 = vpop.permute.xlu0 %357 }
 0x14e   : > { %v378_v42 = vadd.f32 %v356_v50, %v330_v40  ;;  %v379_v57 = vadd.f32 %v358_v51, %v331_v34 }
 0x151   : > { %v360_v52 = vpop.permute.xlu1 %359  ;;  %v362_v53 = vpop.permute.xlu0 %361 }
 0x155   : > { %v364_v54 = vpop.permute.xlu1 %363  ;;  %v366_v55 = vpop.permute.xlu0 %365 }
 0x156   : > { %v382_v41 = vadd.f32 %v364_v54, %v334_v30 }
 0x159   : > { %v1067_v56 = vpop.permute.xlu1 %367  ;;  %v394_v0 = vpop.permute.xlu0 %393 }
 0x15a   : > { %1187 = vst [vmem:[#allocation14_spill] sm:$0xff] %v1067_v56  ;;  %v269_v56 = vadd.f32 %v250_v29, %v969_v37  ;;  %v417_v35 = vadd.f32 %v394_v0, %v377_v21  ;;  %v332_v37 = vadd.f32 %v1007_v60, %v308_v33  ;;  %v335_v60 = vadd.f32 %v1017_v63, %v311_v36 }
 0x15c   : > { %v309_v20 = vadd.f32 %v290_v45, %v269_v56  ;;  %v441_v58 = vadd.f32 %v1034_v17, %v417_v35  ;;  %v380_v21 = vadd.f32 %v360_v52, %v332_v37  ;;  %v383_v32 = vadd.f32 %v366_v55, %v335_v60 }
 0x15d   : > { %v396_v2 = vpop.permute.xlu1 %395  ;;  %v398_v3 = vpop.permute.xlu0 %397 }
 0x15e   : > { %v333_v28 = vadd.f32 %v1009_v61, %v309_v20  ;;  %v418_v29 = vadd.f32 %v396_v2, %v378_v42  ;;  %v419_v44 = vadd.f32 %v398_v3, %v379_v57 }
 0x160   : > { %v381_v38 = vadd.f32 %v362_v53, %v333_v28  ;;  %v442_v20 = vadd.f32 %v1039_v18, %v418_v29  ;;  %v443_v17 = vadd.f32 %v1041_v19, %v419_v44  ;;  %v1190_v53 = vld [vmem:[#allocation10_spill] sm:$0xff] }
 0x161   : > { %v400_v4 = vpop.permute.xlu1 %399  ;;  %v402_v5 = vpop.permute.xlu0 %401  ;;  %v1191_v0 = vld [vmem:[#allocation14_spill] sm:$0xff] }
 0x162   : > { %v420_v31 = vadd.f32 %v400_v4, %v380_v21  ;;  %v421_v61 = vadd.f32 %v402_v5, %v381_v38  ;;  %v384_v2 = vadd.f32 %v1191_v0, %v336_v62 }
 0x164   : > { %v444_v18 = vadd.f32 %v1189_v48, %v420_v31  ;;  %v445_v54 = vadd.f32 %v1190_v53, %v421_v61 }
 0x165   : > { %v404_v6 = vpop.permute.xlu1 %403  ;;  %v406_v7 = vpop.permute.xlu0 %405 }
 0x166   : > { %v422_v63 = vadd.f32 %v404_v6, %v382_v41  ;;  %v423_v52 = vadd.f32 %v406_v7, %v383_v32 }
 0x168   : > { %v446_v5 = vadd.f32 %v1192_v1, %v422_v63  ;;  %v447_v12 = vadd.f32 %v1194_v11, %v423_v52 }
 0x169   : > { %v1070_v9 = vpop.permute.xlu1 %407  ;;  %v466_v10 = vpop.permute.xlu0 %465 }
 0x16a   : > { %1188 = vst [vmem:[#allocation15_spill] sm:$0xff] %v1070_v9  ;;  %v489_v24 = vadd.f32 %v466_v10, %v441_v58 }
 0x16d   : > { %v468_v14 = vpop.permute.xlu1 %467  ;;  %v470_v15 = vpop.permute.xlu0 %469 }
 0x16e   : > { %v490_v49 = vadd.f32 %v468_v14, %v442_v20  ;;  %v491_v50 = vadd.f32 %v470_v15, %v443_v17 }
 0x171   : > { %v472_v25 = vpop.permute.xlu1 %471  ;;  %v474_v9 = vpop.permute.xlu0 %473  ;;  %v1193_v8 = vld [vmem:[#allocation15_spill] sm:$0xff] }
 0x172   : > { %v492_v3 = vadd.f32 %v472_v25, %v444_v18  ;;  %v493_v4 = vadd.f32 %v474_v9, %v445_v54  ;;  %v424_v10 = vadd.f32 %v1193_v8, %v384_v2  ;;  %v1195_v25 = vld [vmem:[#allocation13_spill] sm:$0xff] }
 0x174   : > { %v448_v40 = vadd.f32 %v1195_v25, %v424_v10 }
 0x175   : > { %v476_v23 = vpop.permute.xlu1 %475  ;;  %v478_v22 = vpop.permute.xlu0 %477 }
 0x176   : > { %v494_v15 = vadd.f32 %v476_v23, %v446_v5  ;;  %v495_v9 = vadd.f32 %v478_v22, %v447_v12 }
 0x179   : > { %v480_v45 = vpop.permute.xlu1 %479  ;;  %v506_v46 = vpop.permute.xlu0 %505 }
 0x17a   : > { %v529_v47 = vadd.f32 %v506_v46, %v489_v24  ;;  %v496_v26 = vadd.f32 %v480_v45, %v448_v40 }
 0x17c   : > { %538 = vst.msk [vmem:[%s1091_s28] sm:$0xff] %vm537_vm3, %v529_v47 }
 0x17d   : > { %v508_v51 = vpop.permute.xlu1 %507  ;;  %v510_v19 = vpop.permute.xlu0 %509 }
 0x17e   : > { %v530_v55 = vadd.f32 %v508_v51, %v490_v49  ;;  %v531_v56 = vadd.f32 %v510_v19, %v491_v50 }
 0x180   : > { %539 = vst.msk [vmem:[%s1091_s28 + $0x8] sm:$0xff] %vm537_vm3, %v530_v55  ;;  %540 = vst.msk [vmem:[%s1091_s28 + $0x10] sm:$0xff] %vm537_vm3, %v531_v56 }
 0x181   : > { %v512_v6 = vpop.permute.xlu1 %511  ;;  %v514_v7 = vpop.permute.xlu0 %513 }
 0x182   : > { %v532_v13 = vadd.f32 %v512_v6, %v492_v3  ;;  %v533_v14 = vadd.f32 %v514_v7, %v493_v4 }
 0x184   : > { %541 = vst.msk [vmem:[%s1091_s28 + $0x18] sm:$0xff] %vm537_vm3, %v532_v13  ;;  %542 = vst.msk [vmem:[%s1091_s28 + $0x20] sm:$0xff] %vm537_vm3, %v533_v14 }
 0x185   : > { %v516_v16 = vpop.permute.xlu1 %515  ;;  %v518_v33 = vpop.permute.xlu0 %517 }
 0x186   : > { %v534_v34 = vadd.f32 %v516_v16, %v494_v15  ;;  %v535_v35 = vadd.f32 %v518_v33, %v495_v9 }
 0x188   : > { %543 = vst.msk [vmem:[%s1091_s28 + $0x28] sm:$0xff] %vm537_vm3, %v534_v34  ;;  %544 = vst.msk [vmem:[%s1091_s28 + $0x30] sm:$0xff] %vm537_vm3, %v535_v35 }
 0x189   : > { %v520_v27 = vpop.permute.xlu1 %519 }
 0x18a   : > { %v536_v42 = vadd.f32 %v520_v27, %v496_v26 }
 0x18c   : > { %545 = vst.msk [vmem:[%s1091_s28 + $0x38] sm:$0xff] %vm537_vm3, %v536_v42 }
 0x18d   : > { %749 = shalt.err (!%p746_p10)
}
 0x18e   : > { %s750_s20 = scalar_lea.hbm %s1120_s5, 1024  ;;  %s754_s24 = scalar_lea.hbm %s1168_s1, 2048 }
 0x18f   : > { %p751_p0 = scmp.ne.s32.totalorder %s1120_s5, %s750_s20  ;;  %p755_p1 = scmp.lt.s32.totalorder %s1120_s5, %s1168_s1 }
 0x190   : > { %p756_p3 = scmp.lt.s32.totalorder %s754_s24, %s750_s20 }
 0x191   : > { %p752_p2 = pnand %p751_p0, %p1196_p12 }
 0x192   : > { %p757_p6 = por %p756_p3, %p755_p1 }
 0x193   : > { %p753_p9 = pneg %p752_p2 }
 0x195   : > { %p758_p11 = pnand %p757_p6, %p753_p9 }
 0x197   : > { %761 = shalt.err (!%p758_p11)
}
 0x198   : > { %s810_s17 = smov 128   ;;  %s811_s25 = smov 8  }
 0x199   : > { %656 = dma.vmem_to_hbm [thread:$0]  (%p1196_p12), %s1122_s2, 1024, %s1120_s5, %s547_s10, %s810_s17, %s810_s17, %s811_s25  }
 0x19a PF: > { %s576_s27 = sand.u32 1, %s788_s6   ;;  %p1197_p13 = scmp.ne.s32.totalorder %s1179_s19, 0 }
 0x19b   : > { %p1198_p4 = scmp.ge.s32.totalorder %s800_s9, 2  ;;  %s577_s28 = scalar_lea.sflag [#allocation5], %s576_s27 }
 0x19d   : > { %p663_p5 = pnand %p1198_p4, %p1197_p13 }
 0x19f   : > { %p664_p7 = pneg %p663_p5 }
 0x1a1   : > { %783 = dma.done.wait (%p664_p7), %s577_s28, 1024  }
 0x1a2   : > { %785 = vsyncadd (%p664_p7), %s577_s28, 4294966272  ;;  %p14_p8 = scmp.ge.s32.totalorder %s847_s12, 4   ;;  %s1199_s6 = smov %s792_s7 }
 0x1a3   : > { %s1200_s7 = smov %s796_s8  ;;  %s1201_s8 = smov %s859_s15 }
 0x1a4   : > { %s1202_s9 = smov %s847_s12  ;;  %16 = sbr.rel (!%p14_p8) target bundleno = 5 (0x5), region = 69 }
 0x1a9   :  { %582 = vsyncpa [#allocation4], 1 }
 0x1aa   :  { %584 = vsyncpa [#allocation4 + $0x1], 1 }
 0x1ab   :  { %585 = vsyncpa [#allocation5], 1 }
 0x1ac   :  { %587 = vsyncpa [#allocation5 + $0x1], 1 }

</bundles_post_ra>
